<compile_context>
chip_gen: v7x
topology: tpu7x:2x2x1
jax: 0.10.0
libtpu: 0.0.40
codegen_flags: <defaults>
</compile_context>

<pallas_src>
import functools

import jax
import jax.numpy as jnp
from jax.experimental import pallas as pl
from jax.experimental.pallas import tpu as pltpu


def _round_up(x, m):
    return (x + m - 1) // m * m


def _mlp_kernel(x_ref,
                w1_ref, t1_ref,
                w2_ref, t2_ref,
                w3_ref, t3_ref,
                w4_ref, b4_ref,
                o_ref):
    x = x_ref[...]
    if x.dtype != jnp.bfloat16:        # static (trace-time) branch: only f32 no-pad path
        x = x.astype(jnp.bfloat16)

    # linear1 (no bias, BN1 scale pre-folded into w1) + BN1 shift + relu
    h = jnp.dot(x, w1_ref[...], preferred_element_type=jnp.float32)
    h = jnp.maximum(h + t1_ref[...], 0.0)

    # linear2 + BN2 shift + relu
    h = jnp.dot(h.astype(jnp.bfloat16), w2_ref[...], preferred_element_type=jnp.float32)
    h = jnp.maximum(h + t2_ref[...], 0.0)

    # linear3 + BN3 shift + relu
    h = jnp.dot(h.astype(jnp.bfloat16), w3_ref[...], preferred_element_type=jnp.float32)
    h = jnp.maximum(h + t3_ref[...], 0.0)

    # linear4 (bias; padded class lanes carry bias = -1e30 -> exp underflows to 0)
    logits = jnp.dot(h.astype(jnp.bfloat16), w4_ref[...],
                     preferred_element_type=jnp.float32) + b4_ref[...]
    m = jnp.max(logits, axis=-1, keepdims=True)
    e = jnp.exp(logits - m)
    # exact divide (not approx reciprocal): rows sum to 1 exactly in f32
    probs = e / jnp.sum(e, axis=-1, keepdims=True)
    o_ref[...] = probs.astype(o_ref.dtype)


def _choose_batch_tiling(B, tile_b, min_grid_steps=2):
    """Pick (batch tile, padded batch).

    Goals: big MXU-friendly tile, multiple of 8, at least `min_grid_steps` grid
    steps for megacore, and whenever possible a tile that divides the 8-padded
    batch so no full-array pad copy of x is needed.
    """
    tile_b = max(8, min(int(tile_b), 2048))   # cap keeps live VMEM well under v7x's 64 MiB
    B8 = _round_up(B, 8)
    # Keep >= min_grid_steps steps so ("parallel",) can shard across both v7x TCs.
    target = min(tile_b, max(8, _round_up(pl.cdiv(B8, min_grid_steps), 8)))
    # Prefer a tile that divides the 8-padded batch; accept down to half the target.
    for cand in range(target, 7, -8):
        if B8 % cand == 0:
            if 2 * cand >= target:
                return cand, B8
            break
    return target, _round_up(B8, target)


def nonlinear_classifier_forward(x, params, *, num_classes, tile_b=2048,
                                 out_dtype=jnp.bfloat16):
    """x: (B, input_dim) float32 or bfloat16. params: dict produced by init_params."""
    B, D = x.shape
    C_pad = params["w4"].shape[1]          # lane-padded class count (multiple of 128)

    tb, B_pad = _choose_batch_tiling(B, tile_b)

    if B_pad != B:
        # pad + bf16 cast fuse into one XLA op; bf16 halves the per-tile x DMA
        x = jnp.pad(x, ((0, B_pad - B), (0, 0))).astype(jnp.bfloat16)
    # else: pass x through unchanged — bf16 producers skip the cast entirely and f32
    # inputs are cast in-kernel, avoiding an extra standalone HBM pass here.

    full = lambda arr: pl.BlockSpec(arr.shape, lambda i: (0,) * arr.ndim)

    grid_spec = pltpu.PrefetchScalarGridSpec(
        num_scalar_prefetch=0,
        grid=(B_pad // tb,),
        in_specs=[
            pl.BlockSpec((tb, D), lambda i: (i, 0)),            # x tile
            full(params["w1"]), full(params["t1"]),
            full(params["w2"]), full(params["t2"]),
            full(params["w3"]), full(params["t3"]),
            full(params["w4"]), full(params["b4"]),
        ],
        out_specs=pl.BlockSpec((tb, C_pad), lambda i: (i, 0)),
    )

    out = pl.pallas_call(
        _mlp_kernel,
        out_shape=jax.ShapeDtypeStruct((B_pad, C_pad), out_dtype),
        grid_spec=grid_spec,
        compiler_params=pltpu.CompilerParams(
            dimension_semantics=("parallel",),
            # above v5e's 16 MiB scoped default so tb>=1024 fits; safely below v7x's
            # 64 MiB physical VMEM
            vmem_limit_bytes=48 * 1024 * 1024,
        ),
    )(x,
      params["w1"], params["t1"],
      params["w2"], params["t2"],
      params["w3"], params["t3"],
      params["w4"], params["b4"])

    # Drop batch padding and padded class lanes.
    return out[:B, :num_classes]


def _kaiming_uniform(key, out_f, in_f):
    # torch.nn.init.kaiming_uniform_ default (a=0, fan_in, leaky_relu): bound = sqrt(6/fan_in)
    bound = jnp.sqrt(6.0 / in_f)
    w = jax.random.uniform(key, (out_f, in_f), jnp.float32, -bound, bound)
    return w.T  # stored as (in, out) so the kernel does x @ W


def _bn_fold(width, eps):
    # Eval-mode BatchNorm1d with freshly-initialized parameters, folded to scale/shift.
    gamma = jnp.ones((width,), jnp.float32)
    beta = jnp.zeros((width,), jnp.float32)
    running_mean = jnp.zeros((width,), jnp.float32)
    running_var = jnp.ones((width,), jnp.float32)
    scale = gamma / jnp.sqrt(running_var + eps)
    shift = beta - running_mean * scale
    return scale, shift


def init_params(key, input_dim, num_classes, eps=1e-5):
    k1, k2, k3, k4 = jax.random.split(key, 4)

    w1 = _kaiming_uniform(k1, 512, input_dim)      # (D,   512)
    w2 = _kaiming_uniform(k2, 512, 512)            # (512, 512)
    w3 = _kaiming_uniform(k3, 256, 512)            # (512, 256)
    w4 = _kaiming_uniform(k4, num_classes, 256)    # (256, C)
    b4 = jnp.zeros((num_classes,), jnp.float32)    # weights_init zero-fills the bias

    s1, t1 = _bn_fold(512, eps)
    s2, t2 = _bn_fold(512, eps)
    s3, t3 = _bn_fold(256, eps)

    # Fold BN scale into the weight columns; keep only the shift for the kernel.
    w1 = w1 * s1[None, :]
    w2 = w2 * s2[None, :]
    w3 = w3 * s3[None, :]

    # Lane-dense output: pad the class axis up to a multiple of 128.  Padded weight
    # columns are zero and padded bias lanes are a huge negative number (kept in f32)
    # so their softmax contribution underflows to exactly 0.
    C_pad = _round_up(num_classes, 128)
    w4p = jnp.zeros((256, C_pad), jnp.float32).at[:, :num_classes].set(w4)
    b4p = jnp.full((C_pad,), -1e30, jnp.float32).at[:num_classes].set(b4)

    params = {
        "w1": w1.astype(jnp.bfloat16), "t1": t1.reshape(1, 512),
        "w2": w2.astype(jnp.bfloat16), "t2": t2.reshape(1, 512),
        "w3": w3.astype(jnp.bfloat16), "t3": t3.reshape(1, 256),
        "w4": w4p.astype(jnp.bfloat16), "b4": b4p.reshape(1, C_pad),
    }
    return params


def _reference_forward(x, params, num_classes):
    """Plain-JAX reference using the same (bf16) folded parameters."""
    h = jnp.dot(x.astype(jnp.bfloat16), params["w1"],
                preferred_element_type=jnp.float32)
    h = jnp.maximum(h + params["t1"], 0.0)
    h = jnp.dot(h.astype(jnp.bfloat16), params["w2"],
                preferred_element_type=jnp.float32)
    h = jnp.maximum(h + params["t2"], 0.0)
    h = jnp.dot(h.astype(jnp.bfloat16), params["w3"],
                preferred_element_type=jnp.float32)
    h = jnp.maximum(h + params["t3"], 0.0)
    logits = jnp.dot(h.astype(jnp.bfloat16), params["w4"],
                     preferred_element_type=jnp.float32) + params["b4"]
    logits = logits[:, :num_classes]
    return jax.nn.softmax(logits, axis=-1)


if __name__ == "__main__":
    INPUT_DIM = 64
    NUM_CLASSES = 10

    key = jax.random.PRNGKey(0)
    kp, kx1, kx2 = jax.random.split(key, 3)
    params = init_params(kp, INPUT_DIM, NUM_CLASSES)

    fwd = jax.jit(functools.partial(nonlinear_classifier_forward,
                                    num_classes=NUM_CLASSES))

    # batch=20: exercises the fused pad+bf16-cast path (pads 20 -> 24, tile 8, 3 steps)
    # batch=16: exercises the no-pad path with the in-kernel f32->bf16 cast (2 steps)
    for batch, kx in ((20, kx1), (16, kx2)):
        x = jax.random.normal(kx, (batch, INPUT_DIM), jnp.float32)
        out = jax.block_until_ready(fwd(x, params))
        assert out.shape == (batch, NUM_CLASSES)
        out32 = out.astype(jnp.float32)
        # softmax rows must sum to 1 (exact divide; bf16 output rounding only)
        assert jnp.allclose(jnp.sum(out32, axis=-1), 1.0, atol=5e-3)
        # match the plain-JAX reference on the same bf16 parameters
        ref = jax.block_until_ready(_reference_forward(x, params, NUM_CLASSES))
        assert jnp.allclose(out32, ref, atol=2e-2), float(jnp.max(jnp.abs(out32 - ref)))

    print("KERNEL_OK")
</pallas_src>

<mosaic_0001>
module attributes {stable_mosaic.version = 11 : i64} {
  func.func @_mlp_kernel(%arg0: i32, %arg1: memref<8x64xbf16, #tpu.memory_space<vmem>>, %arg2: memref<64x512xbf16, #tpu.memory_space<vmem>>, %arg3: memref<1x512xf32, #tpu.memory_space<vmem>>, %arg4: memref<512x512xbf16, #tpu.memory_space<vmem>>, %arg5: memref<1x512xf32, #tpu.memory_space<vmem>>, %arg6: memref<512x256xbf16, #tpu.memory_space<vmem>>, %arg7: memref<1x256xf32, #tpu.memory_space<vmem>>, %arg8: memref<256x128xbf16, #tpu.memory_space<vmem>>, %arg9: memref<1x128xf32, #tpu.memory_space<vmem>>, %arg10: memref<8x128xbf16, #tpu.memory_space<vmem>>) attributes {dimension_semantics = [#tpu.dimension_semantics<parallel>], iteration_bounds = array<i64: 3>, scalar_prefetch = 0 : i64, scratch_operands = 0 : i64, tpu.core_type = #tpu.core_type<tc>, window_params = [{transform_indices = @transform_0, window_bounds = array<i64: 8, 64>}, {pipeline_mode = #tpu.pipeline_mode<synchronous>, transform_indices = @transform_1, window_bounds = array<i64: 64, 512>}, {pipeline_mode = #tpu.pipeline_mode<synchronous>, transform_indices = @transform_2, window_bounds = array<i64: 1, 512>}, {pipeline_mode = #tpu.pipeline_mode<synchronous>, transform_indices = @transform_3, window_bounds = array<i64: 512, 512>}, {pipeline_mode = #tpu.pipeline_mode<synchronous>, transform_indices = @transform_4, window_bounds = array<i64: 1, 512>}, {pipeline_mode = #tpu.pipeline_mode<synchronous>, transform_indices = @transform_5, window_bounds = array<i64: 512, 256>}, {pipeline_mode = #tpu.pipeline_mode<synchronous>, transform_indices = @transform_6, window_bounds = array<i64: 1, 256>}, {pipeline_mode = #tpu.pipeline_mode<synchronous>, transform_indices = @transform_7, window_bounds = array<i64: 256, 128>}, {pipeline_mode = #tpu.pipeline_mode<synchronous>, transform_indices = @transform_8, window_bounds = array<i64: 1, 128>}, {transform_indices = @transform_9, window_bounds = array<i64: 8, 128>}]} {
    %c0 = arith.constant 0 : index
    %c0_0 = arith.constant 0 : index
    %0 = vector.load %arg1[%c0, %c0_0] : memref<8x64xbf16, #tpu.memory_space<vmem>>, vector<8x64xbf16>
    %c0_1 = arith.constant 0 : index
    %c0_2 = arith.constant 0 : index
    %1 = vector.load %arg2[%c0_1, %c0_2] : memref<64x512xbf16, #tpu.memory_space<vmem>>, vector<64x512xbf16>
    %cst = arith.constant dense<0.000000e+00> : vector<8x512xf32>
    %2 = tpu.matmul %0, %1, %cst {dimension_numbers = #tpu.dot_dimension_numbers<[1], [0], [0], [1], [0, 0, 1, 1], [], []>} : vector<8x64xbf16>, vector<64x512xbf16>, vector<8x512xf32> -> vector<8x512xf32>
    %c0_3 = arith.constant 0 : index
    %c0_4 = arith.constant 0 : index
    %3 = vector.load %arg3[%c0_3, %c0_4] : memref<1x512xf32, #tpu.memory_space<vmem>>, vector<1x512xf32>
    %4 = vector.broadcast %3 : vector<1x512xf32> to vector<8x512xf32>
    %5 = arith.addf %2, %4 : vector<8x512xf32>
    %cst_5 = arith.constant 0.000000e+00 : f32
    %6 = vector.broadcast %cst_5 : f32 to vector<8x512xf32>
    %7 = arith.maximumf %5, %6 : vector<8x512xf32>
    %8 = arith.truncf %7 : vector<8x512xf32> to vector<8x512xbf16>
    %c0_6 = arith.constant 0 : index
    %c0_7 = arith.constant 0 : index
    %9 = vector.load %arg4[%c0_6, %c0_7] : memref<512x512xbf16, #tpu.memory_space<vmem>>, vector<512x512xbf16>
    %cst_8 = arith.constant dense<0.000000e+00> : vector<8x512xf32>
    %10 = tpu.matmul %8, %9, %cst_8 {dimension_numbers = #tpu.dot_dimension_numbers<[1], [0], [0], [1], [0, 0, 1, 1], [], []>} : vector<8x512xbf16>, vector<512x512xbf16>, vector<8x512xf32> -> vector<8x512xf32>
    %c0_9 = arith.constant 0 : index
    %c0_10 = arith.constant 0 : index
    %11 = vector.load %arg5[%c0_9, %c0_10] : memref<1x512xf32, #tpu.memory_space<vmem>>, vector<1x512xf32>
    %12 = vector.broadcast %11 : vector<1x512xf32> to vector<8x512xf32>
    %13 = arith.addf %10, %12 : vector<8x512xf32>
    %cst_11 = arith.constant 0.000000e+00 : f32
    %14 = vector.broadcast %cst_11 : f32 to vector<8x512xf32>
    %15 = arith.maximumf %13, %14 : vector<8x512xf32>
    %16 = arith.truncf %15 : vector<8x512xf32> to vector<8x512xbf16>
    %c0_12 = arith.constant 0 : index
    %c0_13 = arith.constant 0 : index
    %17 = vector.load %arg6[%c0_12, %c0_13] : memref<512x256xbf16, #tpu.memory_space<vmem>>, vector<512x256xbf16>
    %cst_14 = arith.constant dense<0.000000e+00> : vector<8x256xf32>
    %18 = tpu.matmul %16, %17, %cst_14 {dimension_numbers = #tpu.dot_dimension_numbers<[1], [0], [0], [1], [0, 0, 1, 1], [], []>} : vector<8x512xbf16>, vector<512x256xbf16>, vector<8x256xf32> -> vector<8x256xf32>
    %c0_15 = arith.constant 0 : index
    %c0_16 = arith.constant 0 : index
    %19 = vector.load %arg7[%c0_15, %c0_16] : memref<1x256xf32, #tpu.memory_space<vmem>>, vector<1x256xf32>
    %20 = vector.broadcast %19 : vector<1x256xf32> to vector<8x256xf32>
    %21 = arith.addf %18, %20 : vector<8x256xf32>
    %cst_17 = arith.constant 0.000000e+00 : f32
    %22 = vector.broadcast %cst_17 : f32 to vector<8x256xf32>
    %23 = arith.maximumf %21, %22 : vector<8x256xf32>
    %24 = arith.truncf %23 : vector<8x256xf32> to vector<8x256xbf16>
    %c0_18 = arith.constant 0 : index
    %c0_19 = arith.constant 0 : index
    %25 = vector.load %arg8[%c0_18, %c0_19] : memref<256x128xbf16, #tpu.memory_space<vmem>>, vector<256x128xbf16>
    %cst_20 = arith.constant dense<0.000000e+00> : vector<8x128xf32>
    %26 = tpu.matmul %24, %25, %cst_20 {dimension_numbers = #tpu.dot_dimension_numbers<[1], [0], [0], [1], [0, 0, 1, 1], [], []>} : vector<8x256xbf16>, vector<256x128xbf16>, vector<8x128xf32> -> vector<8x128xf32>
    %c0_21 = arith.constant 0 : index
    %c0_22 = arith.constant 0 : index
    %27 = vector.load %arg9[%c0_21, %c0_22] : memref<1x128xf32, #tpu.memory_space<vmem>>, vector<1x128xf32>
    %28 = vector.broadcast %27 : vector<1x128xf32> to vector<8x128xf32>
    %29 = arith.addf %26, %28 : vector<8x128xf32>
    %cst_23 = arith.constant dense<0xFF800000> : vector<8xf32>
    %30 = vector.multi_reduction <maximumf>, %29, %cst_23 [1] : vector<8x128xf32> to vector<8xf32>
    %31 = vector.shape_cast %30 : vector<8xf32> to vector<8x1xf32>
    %32 = vector.broadcast %31 : vector<8x1xf32> to vector<8x128xf32>
    %33 = arith.subf %29, %32 : vector<8x128xf32>
    %34 = math.exp %33 : vector<8x128xf32>
    %cst_24 = arith.constant dense<0.000000e+00> : vector<8xf32>
    %35 = vector.multi_reduction <add>, %34, %cst_24 [1] : vector<8x128xf32> to vector<8xf32>
    %36 = vector.shape_cast %35 : vector<8xf32> to vector<8x1xf32>
    %37 = vector.broadcast %36 : vector<8x1xf32> to vector<8x128xf32>
    %38 = arith.divf %34, %37 : vector<8x128xf32>
    %39 = arith.truncf %38 : vector<8x128xf32> to vector<8x128xbf16>
    %c0_25 = arith.constant 0 : index
    %c0_26 = arith.constant 0 : index
    %40 = vector.load %arg10[%c0_25, %c0_26] : memref<8x128xbf16, #tpu.memory_space<vmem>>, vector<8x128xbf16>
    tpu.vector_store %arg10[%c0_25, %c0_26], %39 {strides = array<i32>} : memref<8x128xbf16, #tpu.memory_space<vmem>>, vector<8x128xbf16>,
    return
  }
  func.func @transform_0(%arg0: i32) -> (i32, i32) {
    %c0_i32 = arith.constant 0 : i32
    %c0_i32_0 = arith.constant 0 : i32
    return %arg0, %c0_i32 : i32, i32
  }
  func.func @transform_1(%arg0: i32) -> (i32, i32) {
    %c0_i32 = arith.constant 0 : i32
    %c0_i32_0 = arith.constant 0 : i32
    %c0_i32_1 = arith.constant 0 : i32
    return %c0_i32, %c0_i32_0 : i32, i32
  }
  func.func @transform_2(%arg0: i32) -> (i32, i32) {
    %c0_i32 = arith.constant 0 : i32
    %c0_i32_0 = arith.constant 0 : i32
    %c0_i32_1 = arith.constant 0 : i32
    return %c0_i32, %c0_i32_0 : i32, i32
  }
  func.func @transform_3(%arg0: i32) -> (i32, i32) {
    %c0_i32 = arith.constant 0 : i32
    %c0_i32_0 = arith.constant 0 : i32
    %c0_i32_1 = arith.constant 0 : i32
    return %c0_i32, %c0_i32_0 : i32, i32
  }
  func.func @transform_4(%arg0: i32) -> (i32, i32) {
    %c0_i32 = arith.constant 0 : i32
    %c0_i32_0 = arith.constant 0 : i32
    %c0_i32_1 = arith.constant 0 : i32
    return %c0_i32, %c0_i32_0 : i32, i32
  }
  func.func @transform_5(%arg0: i32) -> (i32, i32) {
    %c0_i32 = arith.constant 0 : i32
    %c0_i32_0 = arith.constant 0 : i32
    %c0_i32_1 = arith.constant 0 : i32
    return %c0_i32, %c0_i32_0 : i32, i32
  }
  func.func @transform_6(%arg0: i32) -> (i32, i32) {
    %c0_i32 = arith.constant 0 : i32
    %c0_i32_0 = arith.constant 0 : i32
    %c0_i32_1 = arith.constant 0 : i32
    return %c0_i32, %c0_i32_0 : i32, i32
  }
  func.func @transform_7(%arg0: i32) -> (i32, i32) {
    %c0_i32 = arith.constant 0 : i32
    %c0_i32_0 = arith.constant 0 : i32
    %c0_i32_1 = arith.constant 0 : i32
    return %c0_i32, %c0_i32_0 : i32, i32
  }
  func.func @transform_8(%arg0: i32) -> (i32, i32) {
    %c0_i32 = arith.constant 0 : i32
    %c0_i32_0 = arith.constant 0 : i32
    %c0_i32_1 = arith.constant 0 : i32
    return %c0_i32, %c0_i32_0 : i32, i32
  }
  func.func @transform_9(%arg0: i32) -> (i32, i32) {
    %c0_i32 = arith.constant 0 : i32
    %c0_i32_0 = arith.constant 0 : i32
    return %arg0, %c0_i32 : i32, i32
  }
}

</mosaic_0001>

<bundles_post_ra>
// kernel: nonlinear_classifier_forward.1
= control target key start
LH: loop header
LB: loop body
LE: loop exit
PB: predicated region body
PF: predicated region fallthrough
CT: control target
= control target key end

     0   :  { %14 = vsyncpa [#allocation3], 0  ;;  %s3398_s0 = inlined_call_operand.vmem [shape: bf16[24,64], index: 0, kind: input, shape index: {}]   ;;  %s3399_s1 = inlined_call_operand.hbm [shape: bf16[64,512], index: 1, kind: input, shape index: {}]   ;;  %s3400_s2 = inlined_call_operand.vmem [shape: f32[1,512], index: 2, kind: input, shape index: {}]   ;;  %s3401_s3 = inlined_call_operand.hbm [shape: bf16[512,512], index: 3, kind: input, shape index: {}]   ;;  %s3402_s4 = inlined_call_operand.vmem [shape: f32[1,512], index: 4, kind: input, shape index: {}]   ;;  %s3403_s5 = inlined_call_operand.hbm [shape: bf16[512,256], index: 5, kind: input, shape index: {}]   ;;  %s3404_s6 = inlined_call_operand.vmem [shape: f32[1,256], index: 6, kind: input, shape index: {}]   ;;  %s3405_s7 = inlined_call_operand.hbm [shape: bf16[256,128], index: 7, kind: input, shape index: {}]   ;;  %s3406_s8 = inlined_call_operand.vmem [shape: f32[1,128], index: 8, kind: input, shape index: {}]   ;;  %s3407_s9 = inlined_call_operand.vmem [shape: bf16[24,128], index: 9, kind: output, shape index: {}]  }
   0x1   :  { %15 = vsyncpa [#allocation5], 0 }
   0x2   :  { %16 = vsyncpa [#allocation8], 0  ;;  %s3188_s30 = smov 0  }
   0x3 LB: > { %s3194_s10 = sadd.s32 4294967295, %s3125_s30   ;;  %p2327_p0 = scmp.ge.s32.totalorder %s3125_s30, 1  ;;  %s3125_s30 = sphi %s3188_s30, %s22_s30  }
   0x4   : > { %p247_p1 = scmp.lt.s32.totalorder %s3125_s30, 4  ;;  %p3408_p2 = scmp.eq.s32.totalorder %s3194_s10, 0 }
   0x5   : > { %s3127_s12 = smov [#allocation4]   ;;  %s3128_s14 = smov [#allocation2]  }
   0x6   : > { %p3199_p3 = pnand %p2327_p0, %p247_p1  ;;  %s275_s13 = sshll.u32 %s3127_s12, 4  ;;  %s3203_s13 = int_to_ptr.vmem [resolvable:$true] %s275_s13 }
   0x7   : > { %s259_s15 = sshll.u32 %s3128_s14, 4  ;;  %s3129_s17 = smov [#allocation6]   ;;  %s3207_s15 = int_to_ptr.vmem [resolvable:$true] %s259_s15 }
   0x8   : > { %s3410_s11 = scalar_select %p3199_p3, 1, 0 }
   0x9   : > { %p2623_p4 = pneg %p3199_p3  ;;  %s291_s18 = sshll.u32 %s3129_s17, 4  ;;  %s3215_s18 = int_to_ptr.vmem [resolvable:$true] %s291_s18 }
   0xa   : > { %s2995_s21 = scalar_lea.hbm %s3401_s3, 16384 }
   0xb   : > { %p3211_p5 = pnand %p3408_p2, %p2623_p4  ;;  %p2996_p6 = scmp.ne.s32.totalorder %s3401_s3, %s2995_s21 }
   0xc   : > { %p3002_p10 = scmp.lt.u32.totalorder %s2995_s21, %s3401_s3 }
   0xd   : > { %p3225_p7 = pneg %p3211_p5 }
   0xf   : > { %p2998_p8 = pnand %p3225_p7, %p2996_p6 }
  0x11   : > { %p2999_p9 = pneg %p2998_p8 }
  0x13   : > { %p3004_p11 = pnand %p3002_p10, %p2999_p9 }
  0x15   : > { %3007 = shalt.err (!%p3004_p11)
}
  0x16   : > { %s3008_s27 = scalar_lea.vmem %s3203_s13, 16384  ;;  %p3016_p1 = scmp.lt.s32.totalorder %s3203_s13, %s3203_s13 }
  0x17   : > { %p3009_p12 = scmp.ne.s32.totalorder %s3203_s13, %s3008_s27  ;;  %p3017_p4 = scmp.lt.s32.totalorder %s3008_s27, %s3008_s27 }
  0x19   : > { %p3011_p13 = pnand %p3009_p12, %p3225_p7  ;;  %p3018_p6 = por %p3017_p4, %p3016_p1 }
  0x1b   : > { %p3012_p0 = pneg %p3011_p13 }
  0x1d   : > { %p3019_p8 = pnand %p3018_p6, %p3012_p0 }
  0x1f   : > { %3022 = shalt.err (!%p3019_p8)
}
  0x20   : > { %s3130_s28 = smov 256   ;;  %s3131_s29 = smov 16  }
  0x21   : > { %2629 = dma.hbm_to_vmem [thread:$0]  (!%p3211_p5), %s3401_s3, 16384, %s3203_s13, [#allocation5], %s3130_s28, %s3130_s28, %s3131_s29  }
  0x22   : > { %s3023_s20 = scalar_lea.hbm %s3399_s1, 2048 }
  0x23   : > { %p3024_p9 = scmp.ne.s32.totalorder %s3399_s1, %s3023_s20  ;;  %p3030_p12 = scmp.lt.u32.totalorder %s3023_s20, %s3399_s1 }
  0x25   : > { %p3026_p10 = pnand %p3024_p9, %p3225_p7 }
  0x27   : > { %p3027_p11 = pneg %p3026_p10 }
  0x29   : > { %p3032_p13 = pnand %p3030_p12, %p3027_p11 }
  0x2b   : > { %3035 = shalt.err (!%p3032_p13)
}
  0x2c   : > { %s3036_s13 = scalar_lea.vmem %s3207_s15, 2048  ;;  %p3044_p6 = scmp.lt.s32.totalorder %s3207_s15, %s3207_s15 }
  0x2d   : > { %p3037_p0 = scmp.ne.s32.totalorder %s3207_s15, %s3036_s13  ;;  %p3045_p8 = scmp.lt.s32.totalorder %s3036_s13, %s3036_s13 }
  0x2f   : > { %p3039_p1 = pnand %p3037_p0, %p3225_p7  ;;  %p3046_p9 = por %p3045_p8, %p3044_p6 }
  0x31   : > { %p3040_p4 = pneg %p3039_p1 }
  0x33   : > { %p3047_p10 = pnand %p3046_p9, %p3040_p4 }
  0x35   : > { %3050 = shalt.err (!%p3047_p10)
}
  0x36   : > { %2626 = dma.hbm_to_vmem [thread:$0]  (!%p3211_p5), %s3399_s1, 2048, %s3207_s15, [#allocation3], %s3130_s28, %s3130_s28, %s3131_s29  }
  0x37   : > { %s3051_s17 = scalar_lea.hbm %s3403_s5, 8192 }
  0x38   : > { %p3052_p11 = scmp.ne.s32.totalorder %s3403_s5, %s3051_s17  ;;  %p3058_p0 = scmp.lt.u32.totalorder %s3051_s17, %s3403_s5 }
  0x3a   : > { %p3054_p12 = pnand %p3052_p11, %p3225_p7 }
  0x3c   : > { %p3055_p13 = pneg %p3054_p12 }
  0x3e   : > { %p3060_p1 = pnand %p3058_p0, %p3055_p13 }
  0x40   : > { %3063 = shalt.err (!%p3060_p1)
}
  0x41   : > { %s3064_s15 = scalar_lea.vmem %s3215_s18, 8192  ;;  %p3072_p9 = scmp.lt.s32.totalorder %s3215_s18, %s3215_s18 }
  0x42   : > { %p3065_p4 = scmp.ne.s32.totalorder %s3215_s18, %s3064_s15  ;;  %p3073_p10 = scmp.lt.s32.totalorder %s3064_s15, %s3064_s15 }
  0x44   : > { %p3067_p6 = pnand %p3065_p4, %p3225_p7  ;;  %p3074_p11 = por %p3073_p10, %p3072_p9 }
  0x46   : > { %p3068_p8 = pneg %p3067_p6 }
  0x48   : > { %p3075_p12 = pnand %p3074_p11, %p3068_p8 }
  0x4a   : > { %3078 = shalt.err (!%p3075_p12)
}
  0x4b   : > { %s3132_s28 = smov 128   ;;  %s3133_s29 = smov 8  }
  0x4c   : > { %2632 = dma.hbm_to_vmem [thread:$0]  (!%p3211_p5), %s3403_s5, 8192, %s3215_s18, [#allocation5], %s3132_s28, %s3132_s28, %s3133_s29  }
  0x4d   : > { %s3134_s13 = smov [#allocation7]   ;;  %s3079_s14 = scalar_lea.hbm %s3405_s7, 2048 }
  0x4e   : > { %s307_s26 = sshll.u32 %s3134_s13, 4  ;;  %p3080_p13 = scmp.ne.s32.totalorder %s3405_s7, %s3079_s14  ;;  %s308_s26 = int_to_ptr.vmem [resolvable:$true] %s307_s26 }
  0x4f   : > { %p3086_p4 = scmp.lt.u32.totalorder %s3079_s14, %s3405_s7 }
  0x50   : > { %p3082_p0 = pnand %p3080_p13, %p3225_p7 }
  0x52   : > { %p3083_p1 = pneg %p3082_p0 }
  0x54   : > { %p3088_p6 = pnand %p3086_p4, %p3083_p1 }
  0x56   : > { %3091 = shalt.err (!%p3088_p6)
}
  0x57   : > { %s3092_s18 = scalar_lea.vmem %s308_s26, 2048  ;;  %p3100_p11 = scmp.lt.s32.totalorder %s308_s26, %s308_s26 }
  0x58   : > { %p3093_p8 = scmp.ne.s32.totalorder %s308_s26, %s3092_s18  ;;  %p3101_p12 = scmp.lt.s32.totalorder %s3092_s18, %s3092_s18 }
  0x5a   : > { %p3095_p9 = pnand %p3093_p8, %p3225_p7  ;;  %p3102_p2 = por %p3101_p12, %p3100_p11 }
  0x5c   : > { %p3096_p10 = pneg %p3095_p9 }
  0x5e   : > { %p3103_p3 = pnand %p3102_p2, %p3096_p10 }
  0x60   : > { %3106 = shalt.err (!%p3103_p3)
}
  0x61   : > { %s3135_s22 = smov 64   ;;  %s3136_s15 = smov 4  }
  0x62   : > { %2635 = dma.hbm_to_vmem [thread:$0]  (!%p3211_p5), %s3405_s7, 2048, %s308_s26, [#allocation8], %s3135_s22, %s3135_s22, %s3136_s15  }
  0x63   : > { %p3413_p13 = scmp.ne.s32.totalorder %s3410_s11, 0 }
  0x64   : > { %p3414_p0 = scmp.eq.s32.totalorder (!%p3413_p13), %s3194_s10, 0 }
  0x65   : > { %333 = sbr.rel (%p3413_p13) target bundleno = 1452 (0x5ac), region = 56 }
  0x6c   : > { %3112 = dma.done.wait (%p3414_p0), [#allocation3], 2048   ;;  %p3415_p7 = pmov %p3414_p0 }
  0x6d   : > { %p3416_p2 = pmov %p3414_p0 }
  0x6e   : > { %3114 = vsyncadd (%p3415_p7), [#allocation3], 4294965248 }
  0x6f   : > { %3116 = dma.done.wait (%p3416_p2), [#allocation5], 24576   ;;  %p3417_p3 = pmov %p3414_p0 }
  0x70   : > { %p3418_p1 = pmov %p3414_p0 }
  0x71   : > { %3118 = vsyncadd (%p3417_p3), [#allocation5], 4294942720 }
  0x72   : > { %3120 = dma.done.wait (%p3418_p1), [#allocation8], 2048   ;;  %p3419_p5 = pmov %p3414_p0 }
  0x73   : > { %v3137_v0 = vmov 0   ;;  %p379_p4 = scmp.lt.s32.totalorder %s3194_s10, 2  ;;  %v2663_v1 = vld [vmem:[#allocation2 + $0x4] ss:$16 sps:$4 sm:$0xff]   ;;  %v2665_v2 = vld [vmem:[#allocation2] ss:$16 sps:$4 sm:$0xff]  }
  0x74   : > { %3122 = vsyncadd (%p3419_p5), [#allocation8], 4294965248  ;;  %543 = vmatprep.mubr.bf16.mxu0 %v3137_v0  ;;  %511 = vmatprep.subr.bf16.mxu0 %v2663_v1  ;;  %v2666_v3 = vld [vmem:[#allocation2 + $0x24] ss:$16 sps:$4 sm:$0xff]   ;;  %v2668_v4 = vld [vmem:[#allocation2 + $0x20] ss:$16 sps:$4 sm:$0xff]  }
  0x75   : > { %512 = vmatpush1.bf16.msra.mxu0 %v2665_v2  ;;  %s3421_s10 = smov (!%p379_p4, %s3194_s10), 2  ;;  %v2669_v5 = vld [vmem:[#allocation2 + $0x44] ss:$16 sps:$4 sm:$0xff]   ;;  %v2671_v6 = vld [vmem:[#allocation2 + $0x40] ss:$16 sps:$4 sm:$0xff]   ;;  %vm507_vm0 = vcmask 523264  }
  0x76   : > { %513 = vmatprep.subr.bf16.mxu0 %v2666_v3  ;;  %s2338_s11 = sshll.u32 %s3421_s10, 2  ;;  %v2672_v7 = vld [vmem:[#allocation2 + $0x64] ss:$16 sps:$4 sm:$0xff]   ;;  %v2674_v8 = vld [vmem:[#allocation2 + $0x60] ss:$16 sps:$4 sm:$0xff]  }
  0x77   : > { %s382_s23 = scalar_lea.vmem %s3398_s0, %s2338_s11  ;;  %v2677_v9 = vld [vmem:[#allocation2 + $0xc] ss:$16 sps:$4 sm:$0xff]   ;;  %v2687_v10 = vld [vmem:[#allocation4 + $0x4] ss:$16 sps:$4 sm:$0xff]   ;;  %v2689_v11 = vld [vmem:[#allocation4] ss:$16 sps:$4 sm:$0xff]   ;;  %s386_s18 = scalar_lea.vmem %s3407_s9, %s2338_s11 }
  0x78   : > { %v388_v12 = vld [vmem:[%s382_s23] sm:$0xf]  ;;  %1391 = vmatprep.subr.bf16.mxu1 %v2687_v10  ;;  %v2690_v13 = vld [vmem:[#allocation4 + $0x24] ss:$16 sps:$4 sm:$0xff]   ;;  %v2675_v14 = vld [vmem:[#allocation2 + $0x8] ss:$16 sps:$4 sm:$0xff]  }
  0x79   : > { %514 = vmatpush1.bf16.msra.mxu0 %v2668_v4  ;;  %1392 = vmatpush1.bf16.msra.mxu1 %v2689_v11  ;;  %v2692_v15 = vld [vmem:[#allocation4 + $0x20] ss:$16 sps:$4 sm:$0xff]   ;;  %v2680_v16 = vld [vmem:[#allocation2 + $0x2c] ss:$16 sps:$4 sm:$0xff]   ;;  %v2693_v17 = vld [vmem:[#allocation4 + $0x44] ss:$16 sps:$4 sm:$0xff]  }
  0x7a   : > { %515 = vmatprep.subr.bf16.mxu0 %v2669_v5  ;;  %1393 = vmatprep.subr.bf16.mxu1 %v2690_v13  ;;  %v2678_v18 = vld [vmem:[#allocation2 + $0x28] ss:$16 sps:$4 sm:$0xff]   ;;  %v2695_v19 = vld [vmem:[#allocation4 + $0x40] ss:$16 sps:$4 sm:$0xff]   ;;  %v2696_v20 = vld [vmem:[#allocation4 + $0x64] ss:$16 sps:$4 sm:$0xff]  }
  0x7b   : > { %v2683_v21 = vld [vmem:[#allocation2 + $0x4c] ss:$16 sps:$4 sm:$0xff]   ;;  %v2681_v22 = vld [vmem:[#allocation2 + $0x48] ss:$16 sps:$4 sm:$0xff]   ;;  %v2698_v23 = vld [vmem:[#allocation4 + $0x60] ss:$16 sps:$4 sm:$0xff]  }
  0x7c   : > { %v2699_v24 = vld [vmem:[#allocation4 + $0x84] ss:$16 sps:$4 sm:$0xff]   ;;  %v2686_v25 = vld [vmem:[#allocation2 + $0x6c] ss:$16 sps:$4 sm:$0xff]   ;;  %v2684_v26 = vld [vmem:[#allocation2 + $0x68] ss:$16 sps:$4 sm:$0xff]  }
  0x7d   : > { %516 = vmatpush1.bf16.msra.mxu0 %v2671_v6  ;;  %1394 = vmatpush1.bf16.msra.mxu1 %v2692_v15  ;;  %v2701_v27 = vld [vmem:[#allocation4 + $0x80] ss:$16 sps:$4 sm:$0xff]   ;;  %v2705_v28 = vld [vmem:[#allocation4 + $0xa4] ss:$16 sps:$4 sm:$0xff]   ;;  %v2773_v10 = vld [vmem:[#allocation4 + $0xc] ss:$16 sps:$4 sm:$0xff]  }
  0x7e   : > { %517 = vmatprep.subr.bf16.mxu0 %v2672_v7  ;;  %1395 = vmatprep.subr.bf16.mxu1 %v2693_v17  ;;  %v2704_v29 = vld [vmem:[#allocation4 + $0x204] ss:$16 sps:$4 sm:$0xff]   ;;  %v2702_v30 = vld [vmem:[#allocation4 + $0x200] ss:$16 sps:$4 sm:$0xff]  }
  0x7f   : > { %v2707_v31 = vld [vmem:[#allocation4 + $0xa0] ss:$16 sps:$4 sm:$0xff]   ;;  %v2711_v32 = vld [vmem:[#allocation4 + $0xc4] ss:$16 sps:$4 sm:$0xff]  }
  0x80   : > { %v2710_v33 = vld [vmem:[#allocation4 + $0x224] ss:$16 sps:$4 sm:$0xff]   ;;  %v2708_v34 = vld [vmem:[#allocation4 + $0x220] ss:$16 sps:$4 sm:$0xff]  }
  0x81   : > { %518 = vmatpush1.bf16.msra.mxu0 %v2674_v8  ;;  %1396 = vmatpush1.bf16.msra.mxu1 %v2695_v19  ;;  %v2713_v35 = vld [vmem:[#allocation4 + $0xc0] ss:$16 sps:$4 sm:$0xff]   ;;  %v2717_v36 = vld [vmem:[#allocation4 + $0xe4] ss:$16 sps:$4 sm:$0xff]   ;;  %v407_v19 = vlaneseq }
  0x82   : > { %552 = vmatprep.subr.bf16.mxu0 %v2677_v9  ;;  %1397 = vmatprep.subr.bf16.mxu1 %v2696_v20  ;;  %v2716_v37 = vld [vmem:[#allocation4 + $0x244] ss:$16 sps:$4 sm:$0xff]   ;;  %v2714_v38 = vld [vmem:[#allocation4 + $0x240] ss:$16 sps:$4 sm:$0xff]  }
  0x83   : > { %v2719_v39 = vld [vmem:[#allocation4 + $0xe0] ss:$16 sps:$4 sm:$0xff]   ;;  %v2723_v40 = vld [vmem:[#allocation4 + $0x104] ss:$16 sps:$4 sm:$0xff]   ;;  %v3336_v20 = vshrl.u32 %v407_v19, 7 }
  0x84   : > { %2356 = vmatmul.mubr.msk.bf16.vlgmr.msra.gmra.mrb[0].mxu0 %vm507_vm0, %v388_v12  ;;  %v2722_v41 = vld [vmem:[#allocation4 + $0x264] ss:$16 sps:$4 sm:$0xff]   ;;  %v2720_v42 = vld [vmem:[#allocation4 + $0x260] ss:$16 sps:$4 sm:$0xff]   ;;  %v2813_v19 = vld [vmem:[#allocation4 + $0x148] ss:$16 sps:$4 sm:$0xff]  }
  0x85   : > { %553 = vmatpush1.bf16.msra.mxu0 %v2675_v14  ;;  %584 = vmatprep.mubr.bf16.mxu0 %v3137_v0  ;;  %v2725_v43 = vld [vmem:[#allocation4 + $0x100] ss:$16 sps:$4 sm:$0xff]   ;;  %v2728_v44 = vld [vmem:[#allocation4 + $0x284] ss:$16 sps:$4 sm:$0xff]  }
  0x86   : > { %554 = vmatprep.subr.bf16.mxu0 %v2680_v16  ;;  %1398 = vmatpush1.bf16.msra.mxu1 %v2698_v23  ;;  %v2729_v45 = vld [vmem:[#allocation4 + $0x124] ss:$16 sps:$4 sm:$0xff]   ;;  %v2731_v46 = vld [vmem:[#allocation4 + $0x120] ss:$16 sps:$4 sm:$0xff]   ;;  %v3345_v23 = vsub.s32 1, %v3336_v20 }
  0x87   : > { %1399 = vmatprep.subr.bf16.mxu1 %v2699_v24  ;;  %v2726_v47 = vld [vmem:[#allocation4 + $0x280] ss:$16 sps:$4 sm:$0xff]   ;;  %v2735_v48 = vld [vmem:[#allocation4 + $0x144] ss:$16 sps:$4 sm:$0xff]  }
  0x88   : > { %v2734_v49 = vld [vmem:[#allocation4 + $0x2a4] ss:$16 sps:$4 sm:$0xff]   ;;  %v2737_v50 = vld [vmem:[#allocation4 + $0x140] ss:$16 sps:$4 sm:$0xff]  }
  0x89   : > { %555 = vmatpush1.bf16.msra.mxu0 %v2678_v18  ;;  %v2732_v51 = vld [vmem:[#allocation4 + $0x2a0] ss:$16 sps:$4 sm:$0xff]   ;;  %v2741_v52 = vld [vmem:[#allocation4 + $0x164] ss:$16 sps:$4 sm:$0xff]  }
  0x8a   : > { %556 = vmatprep.subr.bf16.mxu0 %v2683_v21  ;;  %1400 = vmatpush1.bf16.msra.mxu1 %v2701_v27  ;;  %v2740_v53 = vld [vmem:[#allocation4 + $0x2c4] ss:$16 sps:$4 sm:$0xff]   ;;  %v2743_v54 = vld [vmem:[#allocation4 + $0x160] ss:$16 sps:$4 sm:$0xff]   ;;  %v3339_v21 = vsub.s32 0, %v3336_v20 }
  0x8b   : > { %1401 = vmatprep.subr.bf16.mxu1 %v2705_v28  ;;  %v2738_v55 = vld [vmem:[#allocation4 + $0x2c0] ss:$16 sps:$4 sm:$0xff]   ;;  %v2747_v56 = vld [vmem:[#allocation4 + $0x184] ss:$16 sps:$4 sm:$0xff]  }
  0x8c   : > { %v2746_v57 = vld [vmem:[#allocation4 + $0x2e4] ss:$16 sps:$4 sm:$0xff]   ;;  %v2749_v58 = vld [vmem:[#allocation4 + $0x180] ss:$16 sps:$4 sm:$0xff]  }
  0x8d   : > { %557 = vmatpush1.bf16.msra.mxu0 %v2681_v22  ;;  %v2744_v59 = vld [vmem:[#allocation4 + $0x2e0] ss:$16 sps:$4 sm:$0xff]   ;;  %v2753_v60 = vld [vmem:[#allocation4 + $0x1a4] ss:$16 sps:$4 sm:$0xff]  }
  0x8e   : > { %558 = vmatprep.subr.bf16.mxu0 %v2686_v25  ;;  %1402 = vmatpush1.bf16.msra.mxu1 %v2707_v31  ;;  %v2752_v61 = vld [vmem:[#allocation4 + $0x304] ss:$16 sps:$4 sm:$0xff]   ;;  %v2755_v62 = vld [vmem:[#allocation4 + $0x1a0] ss:$16 sps:$4 sm:$0xff]  }
  0x8f   : > { %1403 = vmatprep.subr.bf16.mxu1 %v2711_v32  ;;  %v2750_v63 = vld [vmem:[#allocation4 + $0x300] ss:$16 sps:$4 sm:$0xff]   ;;  %v2758_v0 = vld [vmem:[#allocation4 + $0x324] ss:$16 sps:$4 sm:$0xff]  }
  0x90   : > { %v2756_v1 = vld [vmem:[#allocation4 + $0x320] ss:$16 sps:$4 sm:$0xff]   ;;  %v2759_v2 = vld [vmem:[#allocation4 + $0x1c4] ss:$16 sps:$4 sm:$0xff]  }
  0x91   : > { %559 = vmatpush1.bf16.msra.mxu0 %v2684_v26  ;;  %v2761_v3 = vld [vmem:[#allocation4 + $0x1c0] ss:$16 sps:$4 sm:$0xff]   ;;  %v2764_v4 = vld [vmem:[#allocation4 + $0x344] ss:$16 sps:$4 sm:$0xff]  }
  0x92   : > { %1432 = vmatprep.subr.bf16.mxu0 %v2704_v29  ;;  %1404 = vmatpush1.bf16.msra.mxu1 %v2713_v35  ;;  %v2762_v5 = vld [vmem:[#allocation4 + $0x340] ss:$16 sps:$4 sm:$0xff]   ;;  %v2765_v6 = vld [vmem:[#allocation4 + $0x1e4] ss:$16 sps:$4 sm:$0xff]   ;;  %v2771_v35 = vld [vmem:[#allocation4 + $0x8] ss:$16 sps:$4 sm:$0xff]  }
  0x93   : > { %1405 = vmatprep.subr.bf16.mxu1 %v2717_v36  ;;  %v2767_v7 = vld [vmem:[#allocation4 + $0x1e0] ss:$16 sps:$4 sm:$0xff]   ;;  %v2770_v8 = vld [vmem:[#allocation4 + $0x364] ss:$16 sps:$4 sm:$0xff]  }
  0x94   : > { %2357 = vmatmul.mubr.msk.bf16.vlgmr.msra.gmra.mrb[4].mxu0 %vm507_vm0, %v388_v12  ;;  %v2768_v9 = vld [vmem:[#allocation4 + $0x360] ss:$16 sps:$4 sm:$0xff]   ;;  %v2776_v11 = vld [vmem:[#allocation4 + $0x384] ss:$16 sps:$4 sm:$0xff]  }
  0x95   : > { %1433 = vmatpush1.bf16.msra.mxu0 %v2702_v30  ;;  %v2774_v12 = vld [vmem:[#allocation4 + $0x380] ss:$16 sps:$4 sm:$0xff]   ;;  %v2782_v14 = vld [vmem:[#allocation4 + $0x3a4] ss:$16 sps:$4 sm:$0xff]  }
  0x96   : > { %1434 = vmatprep.subr.bf16.mxu0 %v2710_v33  ;;  %1406 = vmatpush1.bf16.msra.mxu1 %v2719_v39  ;;  %v2780_v13 = vld [vmem:[#allocation4 + $0x3a0] ss:$16 sps:$4 sm:$0xff]   ;;  %v2788_v15 = vld [vmem:[#allocation4 + $0x3c4] ss:$16 sps:$4 sm:$0xff]  }
  0x97   : > { %1407 = vmatprep.subr.bf16.mxu1 %v2723_v40  ;;  %v2786_v16 = vld [vmem:[#allocation4 + $0x3c0] ss:$16 sps:$4 sm:$0xff]   ;;  %v2794_v17 = vld [vmem:[#allocation4 + $0x3e4] ss:$16 sps:$4 sm:$0xff]   ;;  %v2777_v40 = vld [vmem:[#allocation4 + $0x28] ss:$16 sps:$4 sm:$0xff]  }
  0x98   : > { %v2792_v18 = vld [vmem:[#allocation4 + $0x3e0] ss:$16 sps:$4 sm:$0xff]   ;;  %v2881_v39 = vld [vmem:[#allocation6 + $0x4] ss:$8 sps:$4 sm:$0xff]  }
  0x99   : > { %1435 = vmatpush1.bf16.msra.mxu0 %v2708_v34  ;;  %v405_v22 = vld [vmem:[%s3400_s2] sm:$0xf] }
  0x9a   : > { %1436 = vmatprep.subr.bf16.mxu0 %v2716_v37  ;;  %1408 = vmatpush1.bf16.msra.mxu1 %v2725_v43  ;;  %v410_v24 = vrot.slane %v405_v22, %v3339_v21  ;;  %v414_v25 = vrot.slane %v405_v22, %v3345_v23  ;;  %v2779_v37 = vld [vmem:[#allocation4 + $0x2c] ss:$16 sps:$4 sm:$0xff]  }
  0x9b   : > { %1409 = vmatprep.subr.bf16.mxu1 %v2729_v45 }
  0x9d   : > { %1437 = vmatpush1.bf16.msra.mxu0 %v2714_v38  ;;  %v417_v38 = vsub.s32 2, %v3336_v20 }
  0x9e   : > { %1438 = vmatprep.subr.bf16.mxu0 %v2722_v41  ;;  %1410 = vmatpush1.bf16.msra.mxu1 %v2731_v46  ;;  %v421_v41 = vsub.s32 3, %v3336_v20  ;;  %v2791_v46 = vld [vmem:[#allocation4 + $0x6c] ss:$16 sps:$4 sm:$0xff]  }
  0x9f   : > { %1411 = vmatprep.subr.bf16.mxu1 %v2735_v48  ;;  %v418_v43 = vrot.slane %v405_v22, %v417_v38  ;;  %v2990_v20 = vld [vmem:[#allocation7 + $0x38] sm:$0xff]  }
  0xa0   : > { %v422_v45 = vrot.slane %v405_v22, %v421_v41  ;;  %v2897_v22 = vld [vmem:[#allocation6 + $0x60] ss:$8 sps:$4 sm:$0xff]  }
  0xa1   : > { %1439 = vmatpush1.bf16.msra.mxu0 %v2720_v42  ;;  %v2785_v42 = vld [vmem:[#allocation4 + $0x4c] ss:$16 sps:$4 sm:$0xff]  }
  0xa2   : > { %1440 = vmatprep.subr.bf16.mxu0 %v2728_v44  ;;  %1412 = vmatpush1.bf16.msra.mxu1 %v2737_v50  ;;  %v2783_v44 = vld [vmem:[#allocation4 + $0x48] ss:$16 sps:$4 sm:$0xff]  }
  0xa3   : > { %1413 = vmatprep.subr.bf16.mxu1 %v2741_v52 }
  0xa5   : > { %1441 = vmatpush1.bf16.msra.mxu0 %v2726_v47 }
  0xa6   : > { %1442 = vmatprep.subr.bf16.mxu0 %v2734_v49  ;;  %1414 = vmatpush1.bf16.msra.mxu1 %v2743_v54  ;;  %v2797_v54 = vld [vmem:[#allocation4 + $0x8c] ss:$16 sps:$4 sm:$0xff]  }
  0xa7   : > { %1415 = vmatprep.subr.bf16.mxu1 %v2747_v56 }
  0xa9   : > { %1443 = vmatpush1.bf16.msra.mxu0 %v2732_v51  ;;  %v2789_v51 = vld [vmem:[#allocation4 + $0x68] ss:$16 sps:$4 sm:$0xff]  }
  0xaa   : > { %1444 = vmatprep.subr.bf16.mxu0 %v2740_v53  ;;  %1416 = vmatpush1.bf16.msra.mxu1 %v2749_v58 }
  0xab   : > { %1417 = vmatprep.subr.bf16.mxu1 %v2753_v60  ;;  %v2879_v60 = vld [vmem:[#allocation6] ss:$8 sps:$4 sm:$0xff]  }
  0xad   : > { %1445 = vmatpush1.bf16.msra.mxu0 %v2738_v55 }
  0xae   : > { %1446 = vmatprep.subr.bf16.mxu0 %v2746_v57  ;;  %1418 = vmatpush1.bf16.msra.mxu1 %v2755_v62  ;;  %v2884_v62 = vld [vmem:[#allocation6 + $0x14] ss:$8 sps:$4 sm:$0xff]  }
  0xaf   : > { %1419 = vmatprep.subr.bf16.mxu1 %v2759_v2  ;;  %v2887_v2 = vld [vmem:[#allocation6 + $0x24] ss:$8 sps:$4 sm:$0xff]  }
  0xb1   : > { %1447 = vmatpush1.bf16.msra.mxu0 %v2744_v59  ;;  %v2795_v59 = vld [vmem:[#allocation4 + $0x88] ss:$16 sps:$4 sm:$0xff]  }
  0xb2   : > { %1448 = vmatprep.subr.bf16.mxu0 %v2752_v61  ;;  %1420 = vmatpush1.bf16.msra.mxu1 %v2761_v3  ;;  %v2800_v61 = vld [vmem:[#allocation4 + $0xac] ss:$16 sps:$4 sm:$0xff]   ;;  %v2801_v3 = vld [vmem:[#allocation4 + $0xc8] ss:$16 sps:$4 sm:$0xff]  }
  0xb3   : > { %1421 = vmatprep.subr.bf16.mxu1 %v2765_v6  ;;  %v2890_v6 = vld [vmem:[#allocation6 + $0x34] ss:$8 sps:$4 sm:$0xff]  }
  0xb5   : > { %1449 = vmatpush1.bf16.msra.mxu0 %v2750_v63  ;;  %v2798_v63 = vld [vmem:[#allocation4 + $0xa8] ss:$16 sps:$4 sm:$0xff]  }
  0xb6   : > { %1450 = vmatprep.subr.bf16.mxu0 %v2758_v0  ;;  %1422 = vmatpush1.bf16.msra.mxu1 %v2767_v7  ;;  %v2882_v0 = vld [vmem:[#allocation6 + $0x10] ss:$8 sps:$4 sm:$0xff]  }
  0xb7   : > { %1473 = vmatprep.subr.bf16.mxu1 %v2773_v10  ;;  %v2804_v7 = vld [vmem:[#allocation4 + $0xe8] ss:$16 sps:$4 sm:$0xff]   ;;  %v2893_v10 = vld [vmem:[#allocation6 + $0x44] ss:$8 sps:$4 sm:$0xff]  }
  0xb9   : > { %1451 = vmatpush1.bf16.msra.mxu0 %v2756_v1  ;;  %v2803_v1 = vld [vmem:[#allocation4 + $0xcc] ss:$16 sps:$4 sm:$0xff]  }
  0xba   : > { %1452 = vmatprep.subr.bf16.mxu0 %v2764_v4  ;;  %v2885_v4 = vld [vmem:[#allocation6 + $0x20] ss:$8 sps:$4 sm:$0xff]  }
  0xbd   : > { %1453 = vmatpush1.bf16.msra.mxu0 %v2762_v5  ;;  %v2806_v5 = vld [vmem:[#allocation4 + $0xec] ss:$16 sps:$4 sm:$0xff]  }
  0xbe   : > { %1454 = vmatprep.subr.bf16.mxu0 %v2770_v8  ;;  %v2888_v8 = vld [vmem:[#allocation6 + $0x30] ss:$8 sps:$4 sm:$0xff]  }
  0xc1   : > { %1455 = vmatpush1.bf16.msra.mxu0 %v2768_v9  ;;  %v2809_v9 = vld [vmem:[#allocation4 + $0x10c] ss:$16 sps:$4 sm:$0xff]  }
  0xc2   : > { %1456 = vmatprep.subr.bf16.mxu0 %v2776_v11  ;;  %v2807_v11 = vld [vmem:[#allocation4 + $0x108] ss:$16 sps:$4 sm:$0xff]  }
  0xc5   : > { %1457 = vmatpush1.bf16.msra.mxu0 %v2774_v12  ;;  %v2891_v12 = vld [vmem:[#allocation6 + $0x40] ss:$8 sps:$4 sm:$0xff]  }
  0xc6   : > { %1458 = vmatprep.subr.bf16.mxu0 %v2782_v14  ;;  %v2896_v14 = vld [vmem:[#allocation6 + $0x54] ss:$8 sps:$4 sm:$0xff]  }
  0xc9   : > { %1459 = vmatpush1.bf16.msra.mxu0 %v2780_v13  ;;  %v2812_v13 = vld [vmem:[#allocation4 + $0x12c] ss:$16 sps:$4 sm:$0xff]  }
  0xca   : > { %1460 = vmatprep.subr.bf16.mxu0 %v2788_v15  ;;  %v2810_v15 = vld [vmem:[#allocation4 + $0x128] ss:$16 sps:$4 sm:$0xff]  }
  0xcd   : > { %1461 = vmatpush1.bf16.msra.mxu0 %v2786_v16  ;;  %v2894_v16 = vld [vmem:[#allocation6 + $0x50] ss:$8 sps:$4 sm:$0xff]  }
  0xce   : > { %1462 = vmatprep.subr.bf16.mxu0 %v2794_v17  ;;  %v2815_v17 = vld [vmem:[#allocation4 + $0x14c] ss:$16 sps:$4 sm:$0xff]  }
  0xd1   : > { %1463 = vmatpush1.bf16.msra.mxu0 %v2792_v18  ;;  %v2899_v18 = vld [vmem:[#allocation6 + $0x64] ss:$8 sps:$4 sm:$0xff]  }
  0xd2   : > { %1959 = vmatprep.subr.bf16.mxu0 %v2881_v39  ;;  %v2825_v39 = vld [vmem:[#allocation4 + $0x1c8] ss:$16 sps:$4 sm:$0xff]  }
 0x157   : > { %v545_v26 = vpop.f32.mrb[0].mxu0 }
 0x158   : > { %v546_v27 = vadd.f32 %v545_v26, %v410_v24  ;;  %v547_v28 = vpop.f32.mrb[1].mxu0  ;;  %v2818_v24 = vld [vmem:[#allocation4 + $0x16c] ss:$16 sps:$4 sm:$0xff]   ;;  %v2816_v26 = vld [vmem:[#allocation4 + $0x168] ss:$16 sps:$4 sm:$0xff]  }
 0x159   : > { %v548_v29 = vadd.f32 %v547_v28, %v414_v25  ;;  %v549_v30 = vpop.f32.mrb[2].mxu0  ;;  %v2902_v25 = vld [vmem:[#allocation6 + $0x74] ss:$8 sps:$4 sm:$0xff]  }
 0x15a   : > { %v593_v31 = vmax.f32 %v546_v27, 0.0  ;;  %v550_v32 = vpop.f32.mrb[3].mxu0  ;;  %v2900_v27 = vld [vmem:[#allocation6 + $0x70] ss:$8 sps:$4 sm:$0xff]   ;;  %v2821_v28 = vld [vmem:[#allocation4 + $0x18c] ss:$16 sps:$4 sm:$0xff]  }
 0x15b   : > { %v594_v33 = vmax.f32 %v548_v29, 0.0  ;;  %v2905_v29 = vld [vmem:[#allocation6 + $0x84] ss:$8 sps:$4 sm:$0xff]   ;;  %v2819_v30 = vld [vmem:[#allocation4 + $0x188] ss:$16 sps:$4 sm:$0xff]  }
 0x15c   : > { %v3349_v36 = vpack.c.bf16 %v593_v31, %v593_v31  ;;  %v2903_v31 = vld [vmem:[#allocation6 + $0x80] ss:$8 sps:$4 sm:$0xff]   ;;  %v2824_v32 = vld [vmem:[#allocation4 + $0x1ac] ss:$16 sps:$4 sm:$0xff]  }
 0x15d   : > { %v598_v34 = vpack.c.bf16 %v594_v33, %v594_v33  ;;  %v2908_v33 = vld [vmem:[#allocation6 + $0x94] ss:$8 sps:$4 sm:$0xff]  }
 0x15f   : > { %1423 = vmatprep.mubr.bf16.mxu1 %v598_v34 }
 0x160   : > { %1424 = vmatmul.mubr.bf16.vlgmr.msra.gmra.mrb[0].mxu1 %v3349_v36 }
 0x161   : > { %1474 = vmatpush1.bf16.msra.mxu1 %v2771_v35  ;;  %1505 = vmatprep.mubr.bf16.mxu1 %v598_v34  ;;  %v2822_v34 = vld [vmem:[#allocation4 + $0x1a8] ss:$16 sps:$4 sm:$0xff]  }
 0x162   : > { %1475 = vmatprep.subr.bf16.mxu1 %v2779_v37  ;;  %v2906_v35 = vld [vmem:[#allocation6 + $0x90] ss:$8 sps:$4 sm:$0xff]   ;;  %v2827_v37 = vld [vmem:[#allocation4 + $0x1cc] ss:$16 sps:$4 sm:$0xff]  }
 0x165   : > { %1476 = vmatpush1.bf16.msra.mxu1 %v2777_v40  ;;  %v2830_v40 = vld [vmem:[#allocation4 + $0x1ec] ss:$16 sps:$4 sm:$0xff]  }
 0x166   : > { %1477 = vmatprep.subr.bf16.mxu1 %v2785_v42  ;;  %v2828_v42 = vld [vmem:[#allocation4 + $0x1e8] ss:$16 sps:$4 sm:$0xff]  }
 0x167   : > { %v586_v47 = vpop.f32.mrb[4].mxu0 }
 0x168   : > { %v587_v48 = vadd.f32 %v586_v47, %v418_v43  ;;  %v588_v49 = vpop.f32.mrb[5].mxu0  ;;  %v2833_v43 = vld [vmem:[#allocation4 + $0x20c] ss:$16 sps:$4 sm:$0xff]  }
 0x169   : > { %v589_v50 = vadd.f32 %v588_v49, %v422_v45  ;;  %1478 = vmatpush1.bf16.msra.mxu1 %v2783_v44  ;;  %v590_v52 = vpop.f32.mrb[6].mxu0  ;;  %v2831_v44 = vld [vmem:[#allocation4 + $0x208] ss:$16 sps:$4 sm:$0xff]   ;;  %v2836_v45 = vld [vmem:[#allocation4 + $0x22c] ss:$16 sps:$4 sm:$0xff]  }
 0x16a   : > { %v595_v53 = vmax.f32 %v587_v48, 0.0  ;;  %1479 = vmatprep.subr.bf16.mxu1 %v2791_v46  ;;  %v591_v55 = vpop.f32.mrb[7].mxu0  ;;  %v2834_v46 = vld [vmem:[#allocation4 + $0x228] ss:$16 sps:$4 sm:$0xff]   ;;  %v2839_v47 = vld [vmem:[#allocation4 + $0x24c] ss:$16 sps:$4 sm:$0xff]  }
 0x16b   : > { %v596_v56 = vmax.f32 %v589_v50, 0.0  ;;  %v2837_v48 = vld [vmem:[#allocation4 + $0x248] ss:$16 sps:$4 sm:$0xff]   ;;  %v2842_v49 = vld [vmem:[#allocation4 + $0x26c] ss:$16 sps:$4 sm:$0xff]  }
 0x16c   : > { %v3358_v57 = vpack.c.bf16 %v595_v53, %v595_v53  ;;  %v2840_v50 = vld [vmem:[#allocation4 + $0x268] ss:$16 sps:$4 sm:$0xff]   ;;  %v2848_v53 = vld [vmem:[#allocation4 + $0x2ac] ss:$16 sps:$4 sm:$0xff]  }
 0x16d   : > { %v3360_v58 = vpack.c.bf16 %v596_v56, %v596_v56  ;;  %1480 = vmatpush1.bf16.msra.mxu1 %v2789_v51  ;;  %v2845_v51 = vld [vmem:[#allocation4 + $0x28c] ss:$16 sps:$4 sm:$0xff]   ;;  %v2843_v52 = vld [vmem:[#allocation4 + $0x288] ss:$16 sps:$4 sm:$0xff]  }
 0x16e   : > { %1481 = vmatprep.subr.bf16.mxu1 %v2797_v54  ;;  %v2851_v54 = vld [vmem:[#allocation4 + $0x2cc] ss:$16 sps:$4 sm:$0xff]   ;;  %v2909_v56 = vld [vmem:[#allocation6 + $0xa0] ss:$8 sps:$4 sm:$0xff]  }
 0x16f   : > { %1464 = vmatprep.mubr.bf16.mxu0 %v3360_v58  ;;  %v2911_v55 = vld [vmem:[#allocation6 + $0xa4] ss:$8 sps:$4 sm:$0xff]  }
 0x170   : > { %1465 = vmatmul.mubr.bf16.vlgmr.msra.gmra.mrb[8].mxu0 %v3358_v57 }
 0x171   : > { %1482 = vmatpush1.bf16.msra.mxu1 %v2795_v59  ;;  %1960 = vmatpush1.bf16.msra.mxu0 %v2879_v60  ;;  %v2854_v59 = vld [vmem:[#allocation4 + $0x2ec] ss:$16 sps:$4 sm:$0xff]   ;;  %v2912_v60 = vld [vmem:[#allocation6 + $0xb0] ss:$8 sps:$4 sm:$0xff]  }
 0x172   : > { %1483 = vmatprep.subr.bf16.mxu1 %v2800_v61  ;;  %1961 = vmatprep.subr.bf16.mxu0 %v2884_v62  ;;  %v2914_v61 = vld [vmem:[#allocation6 + $0xb4] ss:$8 sps:$4 sm:$0xff]   ;;  %v2917_v62 = vld [vmem:[#allocation6 + $0xc4] ss:$8 sps:$4 sm:$0xff]  }
 0x175   : > { %1484 = vmatpush1.bf16.msra.mxu1 %v2798_v63  ;;  %1962 = vmatpush1.bf16.msra.mxu0 %v2882_v0  ;;  %v2852_v63 = vld [vmem:[#allocation4 + $0x2e8] ss:$16 sps:$4 sm:$0xff]   ;;  %v2857_v0 = vld [vmem:[#allocation4 + $0x30c] ss:$16 sps:$4 sm:$0xff]  }
 0x176   : > { %1485 = vmatprep.subr.bf16.mxu1 %v2803_v1  ;;  %1963 = vmatprep.subr.bf16.mxu0 %v2887_v2  ;;  %v2915_v1 = vld [vmem:[#allocation6 + $0xc0] ss:$8 sps:$4 sm:$0xff]   ;;  %v2920_v2 = vld [vmem:[#allocation6 + $0xd4] ss:$8 sps:$4 sm:$0xff]  }
 0x179   : > { %1486 = vmatpush1.bf16.msra.mxu1 %v2801_v3  ;;  %1964 = vmatpush1.bf16.msra.mxu0 %v2885_v4  ;;  %v2855_v3 = vld [vmem:[#allocation4 + $0x308] ss:$16 sps:$4 sm:$0xff]   ;;  %v2860_v4 = vld [vmem:[#allocation4 + $0x32c] ss:$16 sps:$4 sm:$0xff]  }
 0x17a   : > { %1487 = vmatprep.subr.bf16.mxu1 %v2806_v5  ;;  %1965 = vmatprep.subr.bf16.mxu0 %v2890_v6  ;;  %v2918_v5 = vld [vmem:[#allocation6 + $0xd0] ss:$8 sps:$4 sm:$0xff]  }
 0x17b   : > { %v2858_v6 = vld [vmem:[#allocation4 + $0x328] ss:$16 sps:$4 sm:$0xff]  }
 0x17d   : > { %1488 = vmatpush1.bf16.msra.mxu1 %v2804_v7  ;;  %1966 = vmatpush1.bf16.msra.mxu0 %v2888_v8  ;;  %v2863_v7 = vld [vmem:[#allocation4 + $0x34c] ss:$16 sps:$4 sm:$0xff]  }
 0x17e   : > { %1489 = vmatprep.subr.bf16.mxu1 %v2809_v9  ;;  %1967 = vmatprep.subr.bf16.mxu0 %v2893_v10  ;;  %v2923_v8 = vld [vmem:[#allocation6 + $0xe4] ss:$8 sps:$4 sm:$0xff]   ;;  %v2921_v9 = vld [vmem:[#allocation6 + $0xe0] ss:$8 sps:$4 sm:$0xff]  }
 0x17f   : > { %v2861_v10 = vld [vmem:[#allocation4 + $0x348] ss:$16 sps:$4 sm:$0xff]  }
 0x181   : > { %1490 = vmatpush1.bf16.msra.mxu1 %v2807_v11  ;;  %1968 = vmatpush1.bf16.msra.mxu0 %v2891_v12  ;;  %v2866_v11 = vld [vmem:[#allocation4 + $0x36c] ss:$16 sps:$4 sm:$0xff]  }
 0x182   : > { %1491 = vmatprep.subr.bf16.mxu1 %v2812_v13  ;;  %1969 = vmatprep.subr.bf16.mxu0 %v2896_v14  ;;  %v2926_v12 = vld [vmem:[#allocation6 + $0xf4] ss:$8 sps:$4 sm:$0xff]   ;;  %v2924_v13 = vld [vmem:[#allocation6 + $0xf0] ss:$8 sps:$4 sm:$0xff]  }
 0x183   : > { %v2864_v14 = vld [vmem:[#allocation4 + $0x368] ss:$16 sps:$4 sm:$0xff]  }
 0x185   : > { %1492 = vmatpush1.bf16.msra.mxu1 %v2810_v15  ;;  %1970 = vmatpush1.bf16.msra.mxu0 %v2894_v16  ;;  %v2869_v15 = vld [vmem:[#allocation4 + $0x38c] ss:$16 sps:$4 sm:$0xff]  }
 0x186   : > { %1493 = vmatprep.subr.bf16.mxu1 %v2815_v17  ;;  %1971 = vmatprep.subr.bf16.mxu0 %v2899_v18  ;;  %v2929_v16 = vld [vmem:[#allocation6 + $0x104] ss:$8 sps:$4 sm:$0xff]   ;;  %v2867_v17 = vld [vmem:[#allocation4 + $0x388] ss:$16 sps:$4 sm:$0xff]  }
 0x187   : > { %v2872_v18 = vld [vmem:[#allocation4 + $0x3ac] ss:$16 sps:$4 sm:$0xff]  }
 0x189   : > { %1494 = vmatpush1.bf16.msra.mxu1 %v2813_v19  ;;  %1972 = vmatpush1.bf16.msra.mxu0 %v2897_v22  ;;  %v2870_v19 = vld [vmem:[#allocation4 + $0x3a8] ss:$16 sps:$4 sm:$0xff]   ;;  %v2875_v22 = vld [vmem:[#allocation4 + $0x3cc] ss:$16 sps:$4 sm:$0xff]  }
 0x18a   : > { %1495 = vmatprep.subr.bf16.mxu1 %v2818_v24  ;;  %1973 = vmatprep.subr.bf16.mxu0 %v2902_v25  ;;  %v2873_v24 = vld [vmem:[#allocation4 + $0x3c8] ss:$16 sps:$4 sm:$0xff]   ;;  %v2878_v25 = vld [vmem:[#allocation4 + $0x3ec] ss:$16 sps:$4 sm:$0xff]  }
 0x18d   : > { %1496 = vmatpush1.bf16.msra.mxu1 %v2816_v26  ;;  %1974 = vmatpush1.bf16.msra.mxu0 %v2900_v27  ;;  %v2876_v26 = vld [vmem:[#allocation4 + $0x3e8] ss:$16 sps:$4 sm:$0xff]  }
 0x18e   : > { %1497 = vmatprep.subr.bf16.mxu1 %v2821_v28  ;;  %1975 = vmatprep.subr.bf16.mxu0 %v2905_v29 }
 0x191   : > { %1498 = vmatpush1.bf16.msra.mxu1 %v2819_v30  ;;  %1976 = vmatpush1.bf16.msra.mxu0 %v2903_v31  ;;  %v3370_v31 = vld [vmem:[%s3402_s4] sm:$0xf] }
 0x192   : > { %1499 = vmatprep.subr.bf16.mxu1 %v2824_v32  ;;  %1977 = vmatprep.subr.bf16.mxu0 %v2908_v33  ;;  %v2975_v32 = vld [vmem:[#allocation7 + $0x40] sm:$0xff]  }
 0x193   : > { %v2976_v33 = vld [vmem:[#allocation7] sm:$0xff]  }
 0x195   : > { %1500 = vmatpush1.bf16.msra.mxu1 %v2822_v34  ;;  %1978 = vmatpush1.bf16.msra.mxu0 %v2906_v35  ;;  %v2977_v34 = vld [vmem:[#allocation7 + $0x48] sm:$0xff]   ;;  %v734_v35 = vrot.slane %v3370_v31, %v3339_v21 }
 0x196   : > { %1501 = vmatprep.subr.bf16.mxu1 %v2827_v37  ;;  %1979 = vmatprep.subr.bf16.mxu0 %v2911_v55  ;;  %v738_v37 = vrot.slane %v3370_v31, %v3345_v23  ;;  %v2927_v55 = vld [vmem:[#allocation6 + $0x100] ss:$8 sps:$4 sm:$0xff]  }
 0x199   : > { %1502 = vmatpush1.bf16.msra.mxu1 %v2825_v39  ;;  %1980 = vmatpush1.bf16.msra.mxu0 %v2909_v56  ;;  %v2979_v39 = vld [vmem:[#allocation7 + $0x50] sm:$0xff]  }
 0x19a   : > { %1503 = vmatprep.subr.bf16.mxu1 %v2830_v40  ;;  %1981 = vmatprep.subr.bf16.mxu0 %v2914_v61  ;;  %v2930_v61 = vld [vmem:[#allocation6 + $0x110] ss:$8 sps:$4 sm:$0xff]  }
 0x19d   : > { %1504 = vmatpush1.bf16.msra.mxu1 %v2828_v42  ;;  %1982 = vmatpush1.bf16.msra.mxu0 %v2912_v60  ;;  %v2985_v60 = vld [vmem:[#allocation7 + $0x68] sm:$0xff]  }
 0x19e   : > { %1514 = vmatprep.subr.bf16.mxu1 %v2833_v43  ;;  %1983 = vmatprep.subr.bf16.mxu0 %v2917_v62  ;;  %v2935_v62 = vld [vmem:[#allocation6 + $0x124] ss:$8 sps:$4 sm:$0xff]  }
 0x1a0   : > { %1506 = vmatmul.mubr.bf16.vlgmr.msra.gmra.mrb[4].mxu1 %v3349_v36  ;;  %v2846_v36 = vld [vmem:[#allocation4 + $0x2a8] ss:$16 sps:$4 sm:$0xff]  }
 0x1a1   : > { %1515 = vmatpush1.bf16.msra.mxu1 %v2831_v44  ;;  %1546 = vmatprep.mubr.bf16.mxu1 %v3360_v58  ;;  %v2849_v58 = vld [vmem:[#allocation4 + $0x2c8] ss:$16 sps:$4 sm:$0xff]   ;;  %v2980_v44 = vld [vmem:[#allocation7 + $0x10] sm:$0xff]  }
 0x1a2   : > { %1516 = vmatprep.subr.bf16.mxu1 %v2836_v45  ;;  %1984 = vmatpush1.bf16.msra.mxu0 %v2915_v1  ;;  %v2938_v1 = vld [vmem:[#allocation6 + $0x134] ss:$8 sps:$4 sm:$0xff]  }
 0x1a3   : > { %1985 = vmatprep.subr.bf16.mxu0 %v2920_v2  ;;  %v2936_v2 = vld [vmem:[#allocation6 + $0x130] ss:$8 sps:$4 sm:$0xff]  }
 0x1a5   : > { %1517 = vmatpush1.bf16.msra.mxu1 %v2834_v46 }
 0x1a6   : > { %1518 = vmatprep.subr.bf16.mxu1 %v2839_v47  ;;  %1986 = vmatpush1.bf16.msra.mxu0 %v2918_v5  ;;  %v2981_v47 = vld [vmem:[#allocation7 + $0x58] sm:$0xff]  }
 0x1a7   : > { %1987 = vmatprep.subr.bf16.mxu0 %v2923_v8  ;;  %v2944_v5 = vld [vmem:[#allocation6 + $0x154] ss:$8 sps:$4 sm:$0xff]   ;;  %v2945_v8 = vld [vmem:[#allocation6 + $0x160] ss:$8 sps:$4 sm:$0xff]  }
 0x1a9   : > { %1519 = vmatpush1.bf16.msra.mxu1 %v2837_v48 }
 0x1aa   : > { %1520 = vmatprep.subr.bf16.mxu1 %v2842_v49  ;;  %1988 = vmatpush1.bf16.msra.mxu0 %v2921_v9  ;;  %v2950_v9 = vld [vmem:[#allocation6 + $0x174] ss:$8 sps:$4 sm:$0xff]  }
 0x1ab   : > { %1989 = vmatprep.subr.bf16.mxu0 %v2926_v12  ;;  %v2951_v12 = vld [vmem:[#allocation6 + $0x180] ss:$8 sps:$4 sm:$0xff]  }
 0x1ad   : > { %1521 = vmatpush1.bf16.msra.mxu1 %v2840_v50 }
 0x1ae   : > { %1522 = vmatprep.subr.bf16.mxu1 %v2845_v51  ;;  %1990 = vmatpush1.bf16.msra.mxu0 %v2924_v13  ;;  %v2956_v13 = vld [vmem:[#allocation6 + $0x194] ss:$8 sps:$4 sm:$0xff]  }
 0x1af   : > { %2000 = vmatprep.subr.bf16.mxu0 %v2929_v16  ;;  %v2957_v16 = vld [vmem:[#allocation6 + $0x1a0] ss:$8 sps:$4 sm:$0xff]  }
 0x1b1   : > { %1523 = vmatpush1.bf16.msra.mxu1 %v2843_v52 }
 0x1b2   : > { %1524 = vmatprep.subr.bf16.mxu1 %v2848_v53  ;;  %v2982_v53 = vld [vmem:[#allocation7 + $0x18] sm:$0xff]  }
 0x1b5   : > { %1525 = vmatpush1.bf16.msra.mxu1 %v2846_v36  ;;  %v2983_v36 = vld [vmem:[#allocation7 + $0x60] sm:$0xff]  }
 0x1b6   : > { %1526 = vmatprep.subr.bf16.mxu1 %v2851_v54 }
 0x1b9   : > { %1527 = vmatpush1.bf16.msra.mxu1 %v2849_v58  ;;  %v2932_v58 = vld [vmem:[#allocation6 + $0x114] ss:$8 sps:$4 sm:$0xff]  }
 0x1ba   : > { %1528 = vmatprep.subr.bf16.mxu1 %v2854_v59  ;;  %v2984_v59 = vld [vmem:[#allocation7 + $0x20] sm:$0xff]  }
 0x1bd   : > { %1529 = vmatpush1.bf16.msra.mxu1 %v2852_v63  ;;  %v2986_v63 = vld [vmem:[#allocation7 + $0x28] sm:$0xff]  }
 0x1be   : > { %1530 = vmatprep.subr.bf16.mxu1 %v2857_v0  ;;  %v2933_v0 = vld [vmem:[#allocation6 + $0x120] ss:$8 sps:$4 sm:$0xff]  }
 0x1c1   : > { %1531 = vmatpush1.bf16.msra.mxu1 %v2855_v3  ;;  %v2941_v3 = vld [vmem:[#allocation6 + $0x144] ss:$8 sps:$4 sm:$0xff]  }
 0x1c2   : > { %1532 = vmatprep.subr.bf16.mxu1 %v2860_v4  ;;  %v2939_v4 = vld [vmem:[#allocation6 + $0x140] ss:$8 sps:$4 sm:$0xff]  }
 0x1c5   : > { %1533 = vmatpush1.bf16.msra.mxu1 %v2858_v6  ;;  %v2942_v6 = vld [vmem:[#allocation6 + $0x150] ss:$8 sps:$4 sm:$0xff]  }
 0x1c6   : > { %1534 = vmatprep.subr.bf16.mxu1 %v2863_v7  ;;  %v2947_v7 = vld [vmem:[#allocation6 + $0x164] ss:$8 sps:$4 sm:$0xff]  }
 0x1c9   : > { %1535 = vmatpush1.bf16.msra.mxu1 %v2861_v10  ;;  %v2948_v10 = vld [vmem:[#allocation6 + $0x170] ss:$8 sps:$4 sm:$0xff]  }
 0x1ca   : > { %1536 = vmatprep.subr.bf16.mxu1 %v2866_v11  ;;  %v2953_v11 = vld [vmem:[#allocation6 + $0x184] ss:$8 sps:$4 sm:$0xff]  }
 0x1cd   : > { %1537 = vmatpush1.bf16.msra.mxu1 %v2864_v14  ;;  %v2954_v14 = vld [vmem:[#allocation6 + $0x190] ss:$8 sps:$4 sm:$0xff]  }
 0x1ce   : > { %1538 = vmatprep.subr.bf16.mxu1 %v2869_v15  ;;  %v2959_v15 = vld [vmem:[#allocation6 + $0x1a4] ss:$8 sps:$4 sm:$0xff]  }
 0x1d1   : > { %1539 = vmatpush1.bf16.msra.mxu1 %v2867_v17  ;;  %v2962_v17 = vld [vmem:[#allocation6 + $0x1b4] ss:$8 sps:$4 sm:$0xff]  }
 0x1d2   : > { %1540 = vmatprep.subr.bf16.mxu1 %v2872_v18  ;;  %v2960_v18 = vld [vmem:[#allocation6 + $0x1b0] ss:$8 sps:$4 sm:$0xff]  }
 0x1d5   : > { %1541 = vmatpush1.bf16.msra.mxu1 %v2870_v19  ;;  %v2965_v19 = vld [vmem:[#allocation6 + $0x1c4] ss:$8 sps:$4 sm:$0xff]  }
 0x1d6   : > { %1542 = vmatprep.subr.bf16.mxu1 %v2875_v22  ;;  %v2963_v22 = vld [vmem:[#allocation6 + $0x1c0] ss:$8 sps:$4 sm:$0xff]  }
 0x1d9   : > { %1543 = vmatpush1.bf16.msra.mxu1 %v2873_v24  ;;  %v2968_v24 = vld [vmem:[#allocation6 + $0x1d4] ss:$8 sps:$4 sm:$0xff]  }
 0x1da   : > { %1544 = vmatprep.subr.bf16.mxu1 %v2878_v25  ;;  %v2966_v25 = vld [vmem:[#allocation6 + $0x1d0] ss:$8 sps:$4 sm:$0xff]  }
 0x1dd   : > { %1545 = vmatpush1.bf16.msra.mxu1 %v2876_v26  ;;  %v2971_v26 = vld [vmem:[#allocation6 + $0x1e4] ss:$8 sps:$4 sm:$0xff]  }
 0x1de   : > { %2569 = vmatprep.subr.bf16.mxu1 %v2975_v32  ;;  %v746_v32 = vrot.slane %v3370_v31, %v421_v41  ;;  %v1627_v41 = vld [vmem:[%s3404_s6] sm:$0x3] }
 0x1e0   : > { %1547 = vmatmul.mubr.bf16.vlgmr.msra.gmra.mrb[4].mxu1 %v3358_v57  ;;  %v2978_v57 = vld [vmem:[#allocation7 + $0x8] sm:$0xff]  }
 0x1e1   : > { %2570 = vmatpush3.bf16.msra.mxu1 %v2976_v33 }
 0x1e2   : > { %2571 = vmatprep.subr.bf16.mxu1 %v2977_v34 }
 0x1e5   : > { %2572 = vmatpush3.bf16.msra.mxu1 %v2978_v57 }
 0x1e6   : > { %2573 = vmatprep.subr.bf16.mxu1 %v2979_v39 }
 0x1e9   : > { %2574 = vmatpush3.bf16.msra.mxu1 %v2980_v44 }
 0x1ea   : > { %2575 = vmatprep.subr.bf16.mxu1 %v2981_v47  ;;  %v1636_v47 = vrot.slane %v1627_v41, %v3345_v23 }
 0x1ed   : > { %2576 = vmatpush3.bf16.msra.mxu1 %v2982_v53 }
 0x1ee   : > { %2577 = vmatprep.subr.bf16.mxu1 %v2983_v36 }
 0x1f1   : > { %2578 = vmatpush3.bf16.msra.mxu1 %v2984_v59 }
 0x1f2   : > { %2579 = vmatprep.subr.bf16.mxu1 %v2985_v60 }
 0x1f5   : > { %2580 = vmatpush3.bf16.msra.mxu1 %v2986_v63 }
 0x233   : > { %v1425_v27 = vpop.f32.mrb[0].mxu1 }
 0x234   : > { %v1427_v28 = vpop.f32.mrb[1].mxu1  ;;  %v1426_v40 = vadd.f32 %v1425_v27, %v734_v35  ;;  %v2969_v27 = vld [vmem:[#allocation6 + $0x1e0] ss:$8 sps:$4 sm:$0xff]  }
 0x235   : > { %v1429_v29 = vpop.f32.mrb[2].mxu1  ;;  %v1428_v42 = vadd.f32 %v1427_v28, %v738_v37  ;;  %v2974_v28 = vld [vmem:[#allocation6 + $0x1f4] ss:$8 sps:$4 sm:$0xff]  }
 0x236   : > { %v1430_v30 = vpop.f32.mrb[3].mxu1  ;;  %v2972_v29 = vld [vmem:[#allocation6 + $0x1f0] ss:$8 sps:$4 sm:$0xff]  }
 0x237   : > { %v742_v30 = vrot.slane %v3370_v31, %v417_v38  ;;  %v2989_v38 = vld [vmem:[#allocation7 + $0x78] sm:$0xff]   ;;  %v1632_v31 = vrot.slane %v1627_v41, %v3339_v21  ;;  %v2550_v21 = vld [vmem:[%s3406_s8] ss:$0 sm:$0xff] }
 0x243   : > { %v1466_v43 = vpop.f32.mrb[8].mxu0 }
 0x244   : > { %v1467_v45 = vadd.f32 %v1466_v43, %v1426_v40  ;;  %v1468_v46 = vpop.f32.mrb[9].mxu0 }
 0x245   : > { %v1469_v48 = vadd.f32 %v1468_v46, %v1428_v42  ;;  %v1470_v49 = vpop.f32.mrb[10].mxu0  ;;  %v2988_v46 = vld [vmem:[#allocation7 + $0x30] sm:$0xff]  }
 0x246   : > { %v1555_v50 = vmax.f32 %v1467_v45, 0.0  ;;  %v1471_v51 = vpop.f32.mrb[11].mxu0  ;;  %v2987_v45 = vld [vmem:[#allocation7 + $0x70] sm:$0xff]  }
 0x247   : > { %v1556_v52 = vmax.f32 %v1469_v48, 0.0  ;;  %2581 = vmatprep.subr.bf16.mxu1 %v2987_v45 }
 0x248   : > { %v1559_v56 = vpack.c.bf16 %v1555_v50, %v1555_v50  ;;  %2582 = vmatpush3.bf16.msra.mxu1 %v2988_v46 }
 0x249   : > { %v1560_v54 = vpack.c.bf16 %v1556_v52, %v1556_v52  ;;  %2583 = vmatprep.subr.bf16.mxu1 %v2989_v38 }
 0x24b   : > { %1991 = vmatprep.mubr.bf16.mxu0 %v1560_v54 }
 0x24c   : > { %1992 = vmatmul.mubr.bf16.vlgmr.msra.gmra.mrb[12].mxu0 %v1559_v56  ;;  %2584 = vmatpush3.bf16.msra.mxu1 %v2990_v20 }
 0x24d   : > { %2001 = vmatpush1.bf16.msra.mxu0 %v2927_v55 }
 0x24e   : > { %2002 = vmatprep.subr.bf16.mxu0 %v2932_v58 }
 0x251   : > { %2003 = vmatpush1.bf16.msra.mxu0 %v2930_v61 }
 0x252   : > { %2004 = vmatprep.subr.bf16.mxu0 %v2935_v62 }
 0x255   : > { %2005 = vmatpush1.bf16.msra.mxu0 %v2933_v0 }
 0x256   : > { %2006 = vmatprep.subr.bf16.mxu0 %v2938_v1 }
 0x259   : > { %2007 = vmatpush1.bf16.msra.mxu0 %v2936_v2 }
 0x25a   : > { %2008 = vmatprep.subr.bf16.mxu0 %v2941_v3 }
 0x25d   : > { %2009 = vmatpush1.bf16.msra.mxu0 %v2939_v4 }
 0x25e   : > { %2010 = vmatprep.subr.bf16.mxu0 %v2944_v5 }
 0x261   : > { %2011 = vmatpush1.bf16.msra.mxu0 %v2942_v6 }
 0x262   : > { %2012 = vmatprep.subr.bf16.mxu0 %v2947_v7 }
 0x265   : > { %2013 = vmatpush1.bf16.msra.mxu0 %v2945_v8 }
 0x266   : > { %2014 = vmatprep.subr.bf16.mxu0 %v2950_v9 }
 0x269   : > { %2015 = vmatpush1.bf16.msra.mxu0 %v2948_v10 }
 0x26a   : > { %2016 = vmatprep.subr.bf16.mxu0 %v2953_v11 }
 0x26d   : > { %2017 = vmatpush1.bf16.msra.mxu0 %v2951_v12 }
 0x26e   : > { %2018 = vmatprep.subr.bf16.mxu0 %v2956_v13 }
 0x271   : > { %2019 = vmatpush1.bf16.msra.mxu0 %v2954_v14 }
 0x272   : > { %2020 = vmatprep.subr.bf16.mxu0 %v2959_v15 }
 0x275   : > { %2021 = vmatpush1.bf16.msra.mxu0 %v2957_v16 }
 0x276   : > { %2022 = vmatprep.subr.bf16.mxu0 %v2962_v17 }
 0x279   : > { %2023 = vmatpush1.bf16.msra.mxu0 %v2960_v18 }
 0x27a   : > { %2024 = vmatprep.subr.bf16.mxu0 %v2965_v19 }
 0x27d   : > { %2025 = vmatpush1.bf16.msra.mxu0 %v2963_v22 }
 0x27e   : > { %2026 = vmatprep.subr.bf16.mxu0 %v2968_v24 }
 0x281   : > { %2027 = vmatpush1.bf16.msra.mxu0 %v2966_v25 }
 0x282   : > { %2028 = vmatprep.subr.bf16.mxu0 %v2971_v26 }
 0x285   : > { %2029 = vmatpush1.bf16.msra.mxu0 %v2969_v27 }
 0x286   : > { %2030 = vmatprep.subr.bf16.mxu0 %v2974_v28 }
 0x289   : > { %2031 = vmatpush1.bf16.msra.mxu0 %v2972_v29 }
 0x2b3   : > { %v1548_v33 = vpop.f32.mrb[4].mxu1 }
 0x2b4   : > { %v2595_v34 = vadd.f32 %v1548_v33, %v742_v30  ;;  %v1550_v35 = vpop.f32.mrb[5].mxu1 }
 0x2b5   : > { %v2596_v37 = vadd.f32 %v1550_v35, %v746_v32  ;;  %v1552_v57 = vpop.f32.mrb[6].mxu1 }
 0x2b6   : > { %v1557_v39 = vmax.f32 %v2595_v34, 0.0  ;;  %v1553_v40 = vpop.f32.mrb[7].mxu1 }
 0x2b7   : > { %v1558_v42 = vmax.f32 %v2596_v37, 0.0 }
 0x2b8   : > { %v1561_v44 = vpack.c.bf16 %v1557_v39, %v1557_v39 }
 0x2b9   : > { %v1562_v43 = vpack.c.bf16 %v1558_v42, %v1558_v42 }
 0x2bb   : > { %2032 = vmatprep.mubr.bf16.mxu0 %v1562_v43 }
 0x2bc   : > { %2033 = vmatmul.mubr.bf16.vlgmr.msra.gmra.mrb[12].mxu0 %v1561_v44 }
 0x38f   : > { %v2034_v48 = vpop.f32.mrb[12].mxu0 }
 0x390   : > { %v2597_v49 = vadd.f32 %v2034_v48, %v1632_v31  ;;  %v2036_v50 = vpop.f32.mrb[13].mxu0 }
 0x391   : > { %v2598_v51 = vadd.f32 %v2036_v50, %v1636_v47  ;;  %v2038_v52 = vpop.f32.mrb[14].mxu0 }
 0x392   : > { %v2041_v53 = vmax.f32 %v2597_v49, 0.0  ;;  %v2039_v36 = vpop.f32.mrb[15].mxu0 }
 0x393   : > { %v2042_v54 = vmax.f32 %v2598_v51, 0.0 }
 0x394   : > { %v2043_v56 = vpack.c.bf16 %v2041_v53, %v2041_v53 }
 0x395   : > { %v2044_v55 = vpack.c.bf16 %v2042_v54, %v2042_v54 }
 0x397   : > { %2212 = vmatprep.mubr.bf16.mxu1 %v2044_v55 }
 0x398   : > { %2213 = vmatmul.mubr.bf16.vlgmr.msra.gmra.mrb[8].mxu1 %v2043_v56 }
 0x46b   : > { %v2585_v58 = vpop.f32.mrb[8].mxu1 }
 0x46c   : > { %v2586_v59 = vpop.f32.mrb[9].mxu1 }
 0x46d   : > { %v2587_v23 = vadd.f32 %v2586_v59, %v2585_v58  ;;  %v2588_v60 = vpop.f32.mrb[10].mxu1 }
 0x46e   : > { %v2589_v61 = vpop.f32.mrb[11].mxu1 }
 0x46f   : > { %v2215_v62 = vadd.f32 %v2587_v23, %v2550_v21 }
 0x471   : > { %2220 = vmax.xlane.f32.xlu0 %v2215_v62 }
 0x4fe   : > { %v2221_v63 = vpop.xlane.xlu0 %2220 }
 0x4ff   : > { %v2222_v0 = vsub.f32 %v2215_v62, %v2221_v63 }
 0x501   : > { %v2223_v1 = vmul.f32 1.442695, %v2222_v0 }
 0x503   : > { %2991 = vpow2.f32 %v2223_v1 }
 0x50d   : > { %v2992_v2 = vpop.eup %2991 }
 0x50e   : > { %2225 = vadd.xlane.f32.xlu0 %v2992_v2 }
 0x59b   : > { %v2226_v3 = vpop.xlane.xlu0 %2225 }
 0x59c   : > { %2993 = vrcp.f32 %v2226_v3 }
 0x5a6   : > { %v2994_v4 = vpop.eup %2993 }
 0x5a7   : > { %v2228_v5 = vmul.f32 %v2994_v4, %v2992_v2 }
 0x5a9   : > { %v2229_v6 = vpack.c.bf16 %v2228_v5, %v2228_v5 }
 0x5ab   : > { %2230 = vst [vmem:[%s386_s18] sm:$0xf] %v2229_v6 }
 0x5ac PF: > { %s22_s30 = sadd.s32 1, %s3125_s30  }
 0x5ad   : > { %p19_p6 = scmp.ge.s32.totalorder %s22_s30, 5  }
 0x5af   :  { %21 = sbr.rel (!%p19_p6) target bundleno = 3 (0x3), region = 103 }
 0x5b6   :  { %2250 = vsyncpa [#allocation3], 1 }
 0x5b7   :  { %2252 = vsyncpa [#allocation3 + $0x1], 1 }
 0x5b8   :  { %2253 = vsyncpa [#allocation5], 1 }
 0x5b9   :  { %2254 = vsyncpa [#allocation8], 1 }

</bundles_post_ra>
